<compile_context>
chip_gen: v6e
topology: v6e:2x2x1
jax: 0.10.0
libtpu: 0.0.40
codegen_flags: <defaults>
</compile_context>

<pallas_src>
import jax
import jax.numpy as jnp
from jax.experimental import pallas as pl
from jax.experimental.pallas import tpu as pltpu

_LANE = 128
_SUBLANE = 8
_TILE_BYTES = 2 * 1024 * 1024  # per-stream tile target; <=3 streams x 2 bufs <= ~12 MiB


def _round_up(x, m):
    return -(-x // m) * m


def _round_down(x, m):
    return max(m, (x // m) * m)


def _centermark_kernel(key_ref, mask_ref, img_ref, out_ref):
    # key_ref : (1,) f32 scalar in SMEM
    # mask_ref: (1, BC) or (BR, BC) VMEM tile; img_ref/out_ref: (BR, BC) tiles
    x = img_ref[...]
    m = mask_ref[...].astype(x.dtype)
    k = key_ref[0].astype(x.dtype)
    # m*k + (1-m)*x  ==  x + m*(k - x): exact for binary masks, one-ulp-level
    # reassociation for fractional float masks (float images assumed).
    out_ref[...] = x + m * (k - x)


def _tile_shape(NC, HW, itemsize):
    """Pick (BR, BC): BC a multiple of 128 (lane-dense), BR a multiple of the
    dtype sublane, targeting ~_TILE_BYTES per tile regardless of aspect."""
    elems = max(_TILE_BYTES // itemsize, _SUBLANE * _LANE)
    sublane = max(_SUBLANE, (4 // max(itemsize, 1)) * _SUBLANE)  # 8/16/32

    # Lane (last) dim first: as wide as possible for the minimum legal row
    # count, so stores are full-lane vst (the biggest measured store lever).
    min_rows = NC if NC < sublane else sublane
    bc_cap = _round_down(elems // max(min_rows, 1), _LANE)
    BC = min(bc_cap, _round_up(HW, _LANE))

    # Rows: fill the remaining ~2 MiB budget.
    if NC <= sublane:
        BR = NC                                   # full leading dim: always legal
    else:
        rows_cap = _round_down(max(elems // BC, sublane), sublane)
        BR = min(rows_cap, _round_up(NC, sublane))
    return BR, BC, sublane


def _ensure_parallel_blocks(NC, HW, BR, BC, sublane):
    """v7x: make sure there are >= 2 grid blocks along a parallel axis so the
    grid can be sharded across both TensorCores (no effect on v5e/v6e)."""
    gi, gj = pl.cdiv(NC, BR), pl.cdiv(HW, BC)
    while gi * gj < 2:
        if BC > _LANE:
            BC = _round_down(pl.cdiv(BC, 2), _LANE)
        elif NC > sublane and BR > sublane:
            BR = _round_down(pl.cdiv(BR, 2), sublane)
        else:
            break                                  # tiny array; nothing to split
        gi, gj = pl.cdiv(NC, BR), pl.cdiv(HW, BC)
    return BR, BC


def center_mark(img: jax.Array, mask, key) -> jax.Array:
    """img: (..., H, W) float array; mask broadcastable to img; key: scalar."""
    orig_shape = img.shape
    dtype = img.dtype
    assert img.ndim >= 2, "expected (..., H, W) image"
    H, W = int(orig_shape[-2]), int(orig_shape[-1])
    HW = H * W
    NC = 1
    for d in orig_shape[:-2]:
        NC *= int(d)
    itemsize = jnp.dtype(dtype).itemsize

    img2d = img.reshape(NC, HW)

    # --- tiling --------------------------------------------------------------
    BR, BC, sublane = _tile_shape(NC, HW, itemsize)
    BR, BC = _ensure_parallel_blocks(NC, HW, BR, BC, sublane)
    gi, gj = pl.cdiv(NC, BR), pl.cdiv(HW, BC)
    # Grid: HW-axis (j) OUTER, NC-axis (i) INNER, so the shared mask's block
    # index (0, j) is constant across the inner loop and its DMA is elided.
    grid = (gj, gi)

    # --- mask: avoid materializing the full broadcast when it is shared ------
    m_arr = jnp.asarray(mask)
    if m_arr.ndim < 2:
        m_arr = jnp.broadcast_to(m_arr, (H, W))
    lead = m_arr.shape[:-2]
    lead_size = 1
    for d in lead:
        lead_size *= int(d)
    m_cast = m_arr.astype(dtype)

    if lead_size == 1:
        # CenterMark case: one spatial mask shared by every (N, C) slice.
        m_sp = m_cast.reshape(m_cast.shape[-2:])
        mask2d = jnp.broadcast_to(m_sp, (H, W)).reshape(1, HW)
        mask_spec = pl.BlockSpec((1, BC), lambda j, i: (0, j))
        mask_bytes = HW * itemsize
    else:
        # TODO(synk): partial leading broadcasts (e.g. (N,1,H,W) vs (N,C,H,W))
        # could reuse mask rows via a 3-D grid index_map; materialized for now.
        mask2d = jnp.broadcast_to(m_cast, orig_shape[:-2] + (H, W)).reshape(NC, HW)
        mask_spec = pl.BlockSpec((BR, BC), lambda j, i: (i, j))
        mask_bytes = NC * HW * itemsize

    key_arr = jnp.asarray([key], dtype=jnp.float32)  # scalar lives in SMEM

    cost = pl.CostEstimate(
        flops=3 * NC * HW,
        transcendentals=0,
        bytes_accessed=2 * NC * HW * itemsize + mask_bytes,
    )

    out2d = pl.pallas_call(
        _centermark_kernel,
        out_shape=jax.ShapeDtypeStruct((NC, HW), dtype),
        grid=grid,
        in_specs=[
            pl.BlockSpec(memory_space=pltpu.MemorySpace.SMEM),   # key scalar
            mask_spec,                                           # (shared) mask
            pl.BlockSpec((BR, BC), lambda j, i: (i, j)),         # img
        ],
        out_specs=pl.BlockSpec((BR, BC), lambda j, i: (i, j)),
        compiler_params=pltpu.CompilerParams(
            dimension_semantics=("parallel", "parallel")),
        cost_estimate=cost,
    )(key_arr, mask2d, img2d)

    return out2d.reshape(orig_shape)


def _reference(img, mask, key):
    m = jnp.broadcast_to(jnp.asarray(mask, img.dtype), img.shape)
    return m * (jnp.zeros_like(img) + key) + (1.0 - m) * img


if __name__ == "__main__":
    rng = jax.random.PRNGKey(0)
    k0, k1 = jax.random.split(rng)

    # ---- shapes implied by the module: NCHW image + center-square mask ------
    N, C, H, W = 2, 4, 16, 16
    img = jax.random.uniform(k0, (N, C, H, W), dtype=jnp.float32)

    mask = jnp.zeros((1, 1, H, W), dtype=jnp.float32)
    lo, hi = H // 2 - 2, H // 2 + 2
    mask = mask.at[:, :, lo:hi, lo:hi].set(1.0)

    key_val = 3
    out = center_mark(img, mask, key_val)
    jax.block_until_ready(out)

    ref = _reference(img, mask, key_val)
    assert out.shape == img.shape and out.dtype == img.dtype
    assert jnp.allclose(out, ref, atol=1e-5, rtol=1e-6), "mismatch vs reference"

    # ---- a second (still small) shape that exercises multiple grid tiles ----
    N2, C2, H2, W2 = 2, 8, 32, 128          # NC=16, HW=4096
    img2 = jax.random.uniform(k1, (N2, C2, H2, W2), dtype=jnp.float32)
    mask2 = jnp.zeros((1, 1, H2, W2), dtype=jnp.float32)
    mask2 = mask2.at[:, :, H2 // 2 - 4:H2 // 2 + 4,
                     W2 // 2 - 4:W2 // 2 + 4].set(1.0)
    out2 = center_mark(img2, mask2, 7)
    jax.block_until_ready(out2)
    ref2 = _reference(img2, mask2, 7)
    assert jnp.allclose(out2, ref2, atol=1e-5, rtol=1e-6), "mismatch (tiled case)"

    print("KERNEL_OK")
</pallas_src>

<mosaic_0001>
module attributes {stable_mosaic.version = 11 : i64} {
  func.func @_centermark_kernel(%arg0: i32, %arg1: i32, %arg2: memref<1xf32, #tpu.memory_space<smem>>, %arg3: memref<1x128xf32, #tpu.memory_space<vmem>>, %arg4: memref<8x128xf32, #tpu.memory_space<vmem>>, %arg5: memref<8x128xf32, #tpu.memory_space<vmem>>) attributes {dimension_semantics = [#tpu.dimension_semantics<parallel>, #tpu.dimension_semantics<parallel>], iteration_bounds = array<i64: 2, 1>, scalar_prefetch = 0 : i64, scratch_operands = 0 : i64, tpu.core_type = #tpu.core_type<tc>, window_params = [{transform_indices = @transform_0, window_bounds = array<i64: 1>}, {transform_indices = @transform_1, window_bounds = array<i64: 1, 128>}, {transform_indices = @transform_2, window_bounds = array<i64: 8, 128>}, {transform_indices = @transform_3, window_bounds = array<i64: 8, 128>}]} {
    %c0 = arith.constant 0 : index
    %c0_0 = arith.constant 0 : index
    %0 = vector.load %arg4[%c0, %c0_0] : memref<8x128xf32, #tpu.memory_space<vmem>>, vector<8x128xf32>
    %c0_1 = arith.constant 0 : index
    %c0_2 = arith.constant 0 : index
    %1 = vector.load %arg3[%c0_1, %c0_2] : memref<1x128xf32, #tpu.memory_space<vmem>>, vector<1x128xf32>
    %c0_3 = arith.constant 0 : index
    %2 = memref.load %arg2[%c0_3] : memref<1xf32, #tpu.memory_space<smem>>
    %3 = vector.broadcast %2 : f32 to vector<8x128xf32>
    %4 = arith.subf %3, %0 : vector<8x128xf32>
    %5 = vector.broadcast %1 : vector<1x128xf32> to vector<8x128xf32>
    %6 = arith.mulf %5, %4 : vector<8x128xf32>
    %7 = arith.addf %0, %6 : vector<8x128xf32>
    %c0_4 = arith.constant 0 : index
    %c0_5 = arith.constant 0 : index
    %8 = vector.load %arg5[%c0_4, %c0_5] : memref<8x128xf32, #tpu.memory_space<vmem>>, vector<8x128xf32>
    tpu.vector_store %arg5[%c0_4, %c0_5], %7 {strides = array<i32>} : memref<8x128xf32, #tpu.memory_space<vmem>>, vector<8x128xf32>,
    return
  }
  func.func @transform_0(%arg0: i32, %arg1: i32) -> i32 {
    %c0_i32 = arith.constant 0 : i32
    %c0_i32_0 = arith.constant 0 : i32
    return %c0_i32 : i32
  }
  func.func @transform_1(%arg0: i32, %arg1: i32) -> (i32, i32) {
    %c0_i32 = arith.constant 0 : i32
    %c0_i32_0 = arith.constant 0 : i32
    return %c0_i32, %arg0 : i32, i32
  }
  func.func @transform_2(%arg0: i32, %arg1: i32) -> (i32, i32) {
    %c0_i32 = arith.constant 0 : i32
    return %arg1, %arg0 : i32, i32
  }
  func.func @transform_3(%arg0: i32, %arg1: i32) -> (i32, i32) {
    %c0_i32 = arith.constant 0 : i32
    return %arg1, %arg0 : i32, i32
  }
}

</mosaic_0001>

<bundles_post_ra>
// kernel: tpu_custom_call.1
= control target key start
LH: loop header
LB: loop body
LE: loop exit
PB: predicated region body
PF: predicated region fallthrough
CT: control target
= control target key end

     0   :  { %s696_s0 = inlined_call_operand.<no memory space> [shape: f32[1], index: 0, kind: input, shape index: {}]   ;;  %s697_s1 = inlined_call_operand.vmem [shape: f32[1,256], index: 1, kind: input, shape index: {}]   ;;  %s698_s2 = inlined_call_operand.hbm [shape: f32[8,256], index: 2, kind: input, shape index: {}]   ;;  %s699_s3 = inlined_call_operand.hbm [shape: f32[8,256], index: 3, kind: output, shape index: {}]  }
   0x1   :  { %8 = sst [smem:[#allocation2]] %s696_s0 }
   0x2   :  { %9 = vsyncpa [#allocation4], 0 }
   0x3   :  { %11 = vsyncpa [#allocation4 + $0x1], 0 }
   0x4   :  { %12 = vsyncpa [#allocation5], 0 }
   0x5   :  { %14 = vsyncpa [#allocation5 + $0x1], 0  ;;  %s551_s14 = smov 0   ;;  %s553_s15 = smov 0  }
   0x6   :  { %s555_s16 = smov 0   ;;  %s557_s17 = smov 0  }
   0x7   :  { %s559_s18 = smov 0   ;;  %s561_s19 = smov 0  }
   0x8 LB: > { %s340_s0 = sadd.s32 4294967295, %s524_s19   ;;  %s341_s20 = sadd.s32 4294967294, %s524_s19   ;;  %s524_s19 = sphi %s561_s19, %s20_s19   ;;  %s520_s18 = sphi %s559_s18, %s711_s18   ;;  %s516_s17 = sphi %s557_s17, %s710_s17   ;;  %s512_s16 = sphi %s555_s16, %s709_s16   ;;  %s508_s15 = sphi %s553_s15, %s708_s15   ;;  %s504_s14 = sphi %s551_s14, %s707_s14  }
   0x9   : > { %s32_s21 = sadd.s32 1, %s520_s18  ;;  %s88_s22 = sadd.s32 1, %s512_s16 }
   0xa   : > { %p34_p0 = scmp.ge.s32.totalorder %s32_s21, 2  ;;  %p95_p1 = scmp.ne.s32.totalorder %s512_s16, %s508_s15 }
   0xb   : > { %p96_p2 = scmp.eq.s32.totalorder %s524_s19, 0  ;;  %p101_p3 = scmp.ne.s32.totalorder %s508_s15, %s504_s14 }
   0xc   : > { %s713_s21 = smov (%p34_p0, %s32_s21), 0  ;;  %p102_p5 = scmp.eq.s32.totalorder %s340_s0, 0 }
   0xd   : > { %p592_p4 = por %p96_p2, %p95_p1  ;;  %s84_s24 = ssub.s32 %s520_s18, %s713_s21 }
   0xe   : > { %p127_p6 = scmp.eq.s32.totalorder %s340_s0, 1  ;;  %p86_p7 = scmp.eq.s32.totalorder %s84_s24, 0 }
   0xf   : > { %p598_p8 = por %p102_p5, %p101_p3  ;;  %p133_p10 = scmp.eq.s32.totalorder %s341_s20, 1 }
  0x10   : > { %p602_p9 = por %p127_p6, %p95_p1  ;;  %p366_p13 = scmp.lt.s32.totalorder %s524_s19, 2 }
  0x11   : > { %s607_s27 = scalar_select %p86_p7, %s512_s16, %s88_s22  }
  0x12   : > { %p609_p11 = por %p133_p10, %p101_p3  ;;  %s162_s29 = sand.u32 1, %s512_s16  }
  0x13   : > { %s344_s30 = sshll.u32 %s162_s29, 3  ;;  %s345_s4 = sshll.u32 %s520_s18, 7 }
  0x14   : > { %s703_s28 = scalar_select %p609_p11, 1, 0 }
  0x15   : > { %s173_s7 = scalar_lea.hbm %s698_s2, %s345_s4  ;;  %s166_s8 = scalar_lea.vmem [#allocation3], %s344_s30 }
  0x16   : > { %s175_s9 = sshll.u32 %s166_s8, 4  ;;  %p622_p0 = pnand %p366_p13, %p592_p4  ;;  %s176_s9 = int_to_ptr.vmem [resolvable:$true] %s175_s9 }
  0x17   : > { %p346_p1 = scmp.ge.s32.totalorder %s524_s19, 1  ;;  %p180_p2 = scmp.lt.s32.totalorder %s524_s19, 3 }
  0x18   : > { %s163_s11 = scalar_lea.sflag [#allocation4], %s162_s29  ;;  %p418_p3 = pneg %p622_p0 }
  0x19   : > { %s429_s12 = scalar_lea.vmem %s176_s9, 128  ;;  %s526_s13 = smov [#allocation3]  }
  0x1a   : > { %p430_p5 = scmp.ne.s32.totalorder %s176_s9, %s429_s12  ;;  %s434_s0 = sshll.u32 %s526_s13, 4  ;;  %s435_s0 = int_to_ptr.vmem [resolvable:$false] %s434_s0 }
  0x1b   : > { %s436_s20 = scalar_lea.vmem %s435_s0, 256  ;;  %p437_p10 = scmp.lt.s32.totalorder %s176_s9, %s435_s0 }
  0x1c   : > { %p432_p6 = pnand %p430_p5, %p418_p3  ;;  %p438_p12 = scmp.lt.s32.totalorder %s436_s20, %s429_s12 }
  0x1e   : > { %p433_p7 = pneg %p432_p6  ;;  %p439_p4 = por %p438_p12, %p437_p10 }
  0x20   : > { %p440_p13 = pnand %p439_p4, %p433_p7 }
  0x22   : > { %443 = shalt.err (!%p440_p13)
}
  0x23   : > { %361 = dma.hbm_to_vmem [thread:$0]  (!%p622_p0), %s173_s7, 128, %s176_s9, %s163_s11  }
  0x24   : > { %p181_p11 = pnand %p346_p1, %p180_p2 }
  0x25   : > { %s637_s22 = sand.u32 (!%p181_p11), 1, %s508_s15  }
  0x26   : > { %184 = sbr.rel (%p181_p11) target bundleno = 70 (0x46), region = 32  ;;  %s347_s23 = sshll.u32 (!%p181_p11), %s637_s22, 3 }
  0x27   : > { %s187_s24 = scalar_lea.sflag (!%p181_p11), [#allocation4], %s637_s22  ;;  %s190_s29 = scalar_lea.vmem (!%p181_p11), [#allocation3], %s347_s23 }
  0x2b   : > { %495 = dma.done.wait (%p598_p8), %s187_s24, 128  }
  0x2c   : > { %497 = vsyncadd (%p598_p8), %s187_s24, 4294967168  ;;  %p216_p12 = scmp.lt.s32.totalorder %s516_s17, 1  ;;  %s221_s30 = sld [smem:[#allocation2]]  ;;  %v219_v0 = vld [vmem:[%s190_s29] sm:$0xff] }
  0x2d   : > { %s215_s8 = scalar_lea.vmem [#allocation6], %s347_s23  ;;  %s351_s25 = sshll.u32 %s516_s17, 7 }
  0x2e   : > { %s217_s4 = scalar_select %p216_p12, %s516_s17, 1 }
  0x2f   : > { %s249_s9 = sshll.u32 %s215_s8, 4  ;;  %s247_s12 = scalar_lea.hbm %s699_s3, %s351_s25  ;;  %s651_s9 = int_to_ptr.vmem [resolvable:$true] %s249_s9 }
  0x30   : > { %s218_s7 = scalar_lea.vmem %s697_s1, %s217_s4  ;;  %s234_s13 = scalar_lea.sflag [#allocation5], %s637_s22 }
  0x31   : > { %v349_v1 = vld [vmem:[%s218_s7] ss:$0 sm:$0xff]  ;;  %s444_s0 = scalar_lea.vmem %s651_s9, 128  ;;  %s527_s20 = smov [#allocation6]  }
  0x32   : > { %v222_v2 = vstv %s221_s30  ;;  %p445_p8 = scmp.ne.s32.totalorder %s651_s9, %s444_s0  ;;  %s448_s17 = sshll.u32 %s527_s20, 4  ;;  %s449_s17 = int_to_ptr.vmem [resolvable:$false] %s448_s17 }
  0x33   : > { %v223_v3 = vsub.f32 %v222_v2, %v219_v0  ;;  %s450_s23 = scalar_lea.vmem %s449_s17, 256  ;;  %p451_p1 = scmp.lt.s32.totalorder %s651_s9, %s449_s17 }
  0x34   : > { %p446_p11 = pnand %p445_p8, %p602_p9  ;;  %p452_p2 = scmp.lt.s32.totalorder %s450_s23, %s444_s0 }
  0x35   : > { %v230_v4 = vmul.f32 %v349_v1, %v223_v3 }
  0x36   : > { %p447_p0 = pneg %p446_p11  ;;  %p453_p3 = por %p452_p2, %p451_p1 }
  0x37   : > { %v231_v5 = vadd.f32 %v230_v4, %v219_v0 }
  0x38   : > { %p454_p5 = pnand %p453_p3, %p447_p0 }
  0x39   : > { %232 = vst [vmem:[%s215_s8] sm:$0xff] %v231_v5 }
  0x3a   : > { %457 = shalt.err (!%p454_p5)
}
  0x3b   : > { %s458_s24 = scalar_lea.hbm %s247_s12, 128  ;;  %s462_s30 = scalar_lea.hbm %s699_s3, 256 }
  0x3c   : > { %p459_p6 = scmp.ne.s32.totalorder %s247_s12, %s458_s24  ;;  %p463_p4 = scmp.lt.s32.totalorder %s247_s12, %s699_s3 }
  0x3d   : > { %p464_p13 = scmp.lt.s32.totalorder %s462_s30, %s458_s24 }
  0x3e   : > { %p460_p7 = pnand %p459_p6, %p602_p9 }
  0x3f   : > { %p465_p12 = por %p464_p13, %p463_p4 }
  0x40   : > { %p461_p10 = pneg %p460_p7 }
  0x42   : > { %p466_p8 = pnand %p465_p12, %p461_p10 }
  0x44   : > { %469 = shalt.err (!%p466_p8)
}
  0x45   : > { %356 = dma.vmem_to_hbm [thread:$0]  (%p602_p9), %s651_s9, 128, %s247_s12, %s234_s13  }
  0x46 PF: > { %s261_s6 = sand.u32 1, %s504_s14   ;;  %p705_p11 = scmp.ne.s32.totalorder %s703_s28, 0 }
  0x47   : > { %p706_p0 = scmp.ge.s32.totalorder %s524_s19, 2  ;;  %s262_s7 = scalar_lea.sflag [#allocation5], %s261_s6 }
  0x49   : > { %p363_p1 = pnand %p706_p0, %p705_p11 }
  0x4b   : > { %p364_p2 = pneg %p363_p1 }
  0x4d   : > { %499 = dma.done.wait (%p364_p2), %s262_s7, 128  }
  0x4e   : > { %501 = vsyncadd (%p364_p2), %s262_s7, 4294967168  ;;  %s20_s19 = sadd.s32 1, %s524_s19   ;;  %s707_s14 = smov %s508_s15 }
  0x4f   : > { %p17_p3 = scmp.ge.s32.totalorder %s20_s19, 4   ;;  %s708_s15 = smov %s512_s16 }
  0x50   : > { %s709_s16 = smov %s607_s27  ;;  %s710_s17 = smov %s520_s18 }
  0x51   : > { %s711_s18 = smov %s713_s21  ;;  %19 = sbr.rel (!%p17_p3) target bundleno = 8 (0x8), region = 80 }
  0x56   :  { %267 = vsyncpa [#allocation4], 1 }
  0x57   :  { %269 = vsyncpa [#allocation4 + $0x1], 1 }
  0x58   :  { %270 = vsyncpa [#allocation5], 1 }
  0x59   :  { %272 = vsyncpa [#allocation5 + $0x1], 1 }

</bundles_post_ra>
